<compile_context>
chip_gen: v6e
topology: v6e:2x2x1
jax: 0.10.0
libtpu: 0.0.40
codegen_flags: <defaults>
</compile_context>

<pallas_src>
import jax
import jax.numpy as jnp
from jax import lax
from jax.experimental import pallas as pl
from jax.experimental.pallas import tpu as pltpu


# ----------------------------------------------------------------------------
# Kernels  (flattened rows M = B*S live on the LANE axis of the output)
# ----------------------------------------------------------------------------
def _index_embed_kernel(idx_ref, wT_ref, o_ref):
    # idx_ref: (1, tile_m) int32 (lane-major), wT_ref: (E, C), o_ref: (E, tile_m)
    idx = idx_ref[...]                                             # (1, tile_m)
    C = wT_ref.shape[1]
    tile_m = idx.shape[1]
    # One-hot as (C, tile_m): sublane iota vs lane-major indices — the compare
    # only needs a sublane broadcast of idx (VPU), no XLU work.
    sub_iota = lax.broadcasted_iota(jnp.int32, (C, tile_m), 0)     # (C, tile_m)
    onehot = (sub_iota == idx).astype(wT_ref.dtype)                # (C, tile_m)
    # (E, C) @ (C, tile_m) -> (E, tile_m): lane-dense, unmasked stores.
    o_ref[...] = jnp.dot(
        wT_ref[...], onehot, preferred_element_type=jnp.float32
    ).astype(o_ref.dtype)


def _soft_onehot_kernel(x_ref, wT_ref, o_ref):
    # Fallback for soft / multi-hot inputs (true x @ W semantics).
    # x_ref: (tile_m, C), wT_ref: (E, C), o_ref: (E, tile_m)
    o_ref[...] = jnp.einsum(
        "ec,mc->em", wT_ref[...], x_ref[...],
        preferred_element_type=jnp.float32,
    ).astype(o_ref.dtype)


# ----------------------------------------------------------------------------
# Tiling helper
# ----------------------------------------------------------------------------
def _m_tiling(M, max_tile_m=1024):
    """Pick (padded M, M-tile); M sits on the lane axis so tiles are 128-multiples."""
    Mp = pl.cdiv(M, 128) * 128
    if Mp > max_tile_m:
        Mp = pl.cdiv(Mp, max_tile_m) * max_tile_m
        return Mp, max_tile_m
    if Mp >= 512:
        # v7x: guarantee >=2 grid steps on the "parallel" M axis so both
        # TensorCores get work (v5e/v6e single-TC: harmless).
        Mp = pl.cdiv(Mp, 256) * 256
        return Mp, Mp // 2
    return Mp, Mp


def _emt_to_bes(y_emt, M, B, S, E):
    # (E, Mp) -> (B, E, S): slice padding, split M, swap the two LEADING axes.
    # The minor (lane) dim is untouched, so this is cheap layout plumbing.
    return jnp.transpose(y_emt[:, :M].reshape(E, B, S), (1, 0, 2))


# ----------------------------------------------------------------------------
# Wrappers
# ----------------------------------------------------------------------------
def encoder_labels_indices(x_idx, weight, *, max_tile_m=1024):
    """y[B, E, S] = W[x_idx[B, S]].permute(0, 2, 1).  Preferred path."""
    B, S = x_idx.shape
    C, E = weight.shape
    M = B * S
    Mp, tile_m = _m_tiling(M, max_tile_m)

    idx_flat = x_idx.astype(jnp.int32).reshape(1, M)               # lane-major
    if Mp != M:
        # Pad with the padding index (row C-1); padded columns are sliced off.
        idx_flat = jnp.pad(idx_flat, ((0, 0), (0, Mp - M)),
                           constant_values=C - 1)

    wT = weight.T                                                  # (E, C), once

    y_emt = pl.pallas_call(
        _index_embed_kernel,
        out_shape=jax.ShapeDtypeStruct((E, Mp), weight.dtype),
        grid_spec=pltpu.PrefetchScalarGridSpec(
            num_scalar_prefetch=0,
            grid=(Mp // tile_m,),
            in_specs=[
                pl.BlockSpec((1, tile_m), lambda m: (0, m)),       # lane-major idx
                pl.BlockSpec((E, C), lambda m: (0, 0)),            # resident W^T
            ],
            out_specs=pl.BlockSpec((E, tile_m), lambda m: (0, m)),  # lane-dense
        ),
        compiler_params=pltpu.CompilerParams(
            dimension_semantics=("parallel",)),
    )(idx_flat, wT)

    return _emt_to_bes(y_emt, M, B, S, E)                          # (B, E, S)


def encoder_labels_onehot(x_onehot, weight, *, max_tile_m=1024,
                          assume_hard_onehot=True):
    """y[B, E, S] = (x_onehot[B, S, C] @ W[C, E]).permute(0, 2, 1)."""
    B, S, C = x_onehot.shape
    Cw, E = weight.shape
    assert C == Cw

    if assume_hard_onehot:
        # One cheap XLA reduce, then the 4-B/row index path: C-fold less input
        # HBM traffic than streaming the one-hot matrix through the kernel.
        idx = jnp.argmax(x_onehot, axis=-1).astype(jnp.int32)
        return encoder_labels_indices(idx, weight, max_tile_m=max_tile_m)

    # Fallback: exact x @ W for soft / multi-hot inputs, still lane-dense out.
    M = B * S
    Mp, tile_m = _m_tiling(M, max_tile_m)
    x_flat = x_onehot.reshape(M, C)
    if Mp != M:
        x_flat = jnp.pad(x_flat, ((0, Mp - M), (0, 0)))
    wT = weight.T

    y_emt = pl.pallas_call(
        _soft_onehot_kernel,
        out_shape=jax.ShapeDtypeStruct((E, Mp), weight.dtype),
        grid_spec=pltpu.PrefetchScalarGridSpec(
            num_scalar_prefetch=0,
            grid=(Mp // tile_m,),
            in_specs=[
                pl.BlockSpec((tile_m, C), lambda m: (m, 0)),
                pl.BlockSpec((E, C), lambda m: (0, 0)),            # resident W^T
            ],
            out_specs=pl.BlockSpec((E, tile_m), lambda m: (0, m)),  # lane-dense
        ),
        compiler_params=pltpu.CompilerParams(
            dimension_semantics=("parallel",)),
    )(x_flat, wT)

    return _emt_to_bes(y_emt, M, B, S, E)                          # (B, E, S)


# ----------------------------------------------------------------------------
# Main
# ----------------------------------------------------------------------------
if __name__ == "__main__":
    key = jax.random.PRNGKey(0)
    k_w, k_idx = jax.random.split(key)

    # Module hyperparameters (small, consistent with the module's __init__).
    embed_size = 32
    num_classes = 12
    pad_value = num_classes - 1
    B, S = 2, 8

    # Deterministic parameter init: nn.Embedding ~ N(0, 1), padding row zeroed.
    weight = jax.random.normal(k_w, (num_classes, embed_size), dtype=jnp.float32)
    weight = weight.at[pad_value].set(0.0)

    # Inputs: label indices (including the pad value) and their one-hot version.
    x_idx = jax.random.randint(k_idx, (B, S), 0, num_classes, dtype=jnp.int32)
    x_onehot = jax.nn.one_hot(x_idx, num_classes, dtype=jnp.float32)   # (B, S, C)

    # Run all three forward routes through the Pallas kernels.
    y_idx = jax.block_until_ready(encoder_labels_indices(x_idx, weight))
    y_1hot = jax.block_until_ready(encoder_labels_onehot(x_onehot, weight))
    y_soft = jax.block_until_ready(
        encoder_labels_onehot(x_onehot, weight, assume_hard_onehot=False))

    # Pure-JAX reference: embeddings.permute(0, 2, 1)
    ref = jnp.transpose(weight[x_idx], (0, 2, 1))                      # (B, E, S)

    assert y_idx.shape == (B, embed_size, S)
    assert y_1hot.shape == (B, embed_size, S)
    assert y_soft.shape == (B, embed_size, S)
    assert jnp.allclose(y_idx, ref, atol=1e-5), "index path mismatch"
    assert jnp.allclose(y_1hot, ref, atol=1e-5), "one-hot (argmax) path mismatch"
    assert jnp.allclose(y_soft, ref, atol=1e-5), "one-hot (matmul) path mismatch"

    print("KERNEL_OK")
</pallas_src>

<mosaic_0001>
module attributes {stable_mosaic.version = 11 : i64} {
  func.func @_index_embed_kernel(%arg0: i32, %arg1: memref<1x128xi32, #tpu.memory_space<vmem>>, %arg2: memref<32x12xf32, #tpu.memory_space<vmem>>, %arg3: memref<32x128xf32, #tpu.memory_space<vmem>>) attributes {dimension_semantics = [#tpu.dimension_semantics<parallel>], iteration_bounds = array<i64: 1>, scalar_prefetch = 0 : i64, scratch_operands = 0 : i64, tpu.core_type = #tpu.core_type<tc>, window_params = [{transform_indices = @transform_0, window_bounds = array<i64: 1, 128>}, {pipeline_mode = #tpu.pipeline_mode<synchronous>, transform_indices = @transform_1, window_bounds = array<i64: 32, 12>}, {transform_indices = @transform_2, window_bounds = array<i64: 32, 128>}]} {
    %c0 = arith.constant 0 : index
    %c0_0 = arith.constant 0 : index
    %0 = vector.load %arg1[%c0, %c0_0] : memref<1x128xi32, #tpu.memory_space<vmem>>, vector<1x128xi32>
    %1 = tpu.iota {dimensions = array<i32: 0>} : vector<12x128xi32>
    %2 = vector.broadcast %0 : vector<1x128xi32> to vector<12x128xi32>
    %3 = arith.cmpi eq, %1, %2 : vector<12x128xi32>
    %4 = arith.extui %3 : vector<12x128xi1> to vector<12x128xi32>
    %5 = arith.sitofp %4 : vector<12x128xi32> to vector<12x128xf32>
    %c0_1 = arith.constant 0 : index
    %c0_2 = arith.constant 0 : index
    %6 = vector.load %arg2[%c0_1, %c0_2] : memref<32x12xf32, #tpu.memory_space<vmem>>, vector<32x12xf32>
    %cst = arith.constant dense<0.000000e+00> : vector<32x128xf32>
    %7 = tpu.matmul %6, %5, %cst {dimension_numbers = #tpu.dot_dimension_numbers<[1], [0], [0], [1], [0, 0, 1, 1], [], []>} : vector<32x12xf32>, vector<12x128xf32>, vector<32x128xf32> -> vector<32x128xf32>
    %c0_3 = arith.constant 0 : index
    %c0_4 = arith.constant 0 : index
    %8 = vector.load %arg3[%c0_3, %c0_4] : memref<32x128xf32, #tpu.memory_space<vmem>>, vector<32x128xf32>
    tpu.vector_store %arg3[%c0_3, %c0_4], %7 {strides = array<i32>} : memref<32x128xf32, #tpu.memory_space<vmem>>, vector<32x128xf32>,
    return
  }
  func.func @transform_0(%arg0: i32) -> (i32, i32) {
    %c0_i32 = arith.constant 0 : i32
    %c0_i32_0 = arith.constant 0 : i32
    return %c0_i32, %arg0 : i32, i32
  }
  func.func @transform_1(%arg0: i32) -> (i32, i32) {
    %c0_i32 = arith.constant 0 : i32
    %c0_i32_0 = arith.constant 0 : i32
    %c0_i32_1 = arith.constant 0 : i32
    return %c0_i32, %c0_i32_0 : i32, i32
  }
  func.func @transform_2(%arg0: i32) -> (i32, i32) {
    %c0_i32 = arith.constant 0 : i32
    %c0_i32_0 = arith.constant 0 : i32
    return %c0_i32, %arg0 : i32, i32
  }
}

</mosaic_0001>

<bundles_post_ra>
// kernel: tpu_custom_call.1
= control target key start
LH: loop header
LB: loop body
LE: loop exit
PB: predicated region body
PF: predicated region fallthrough
CT: control target
= control target key end

     0   :  { %v13_v0 = vlaneseq  ;;  %vm30_vm0 = vcmask 97280   ;;  %s250_s0 = inlined_call_operand.vmem [shape: s32[1,128], index: 0, kind: input, shape index: {}]   ;;  %s251_s1 = inlined_call_operand.vmem [shape: f32[32,12], index: 1, kind: input, shape index: {}]   ;;  %s252_s2 = inlined_call_operand.hbm [shape: f32[32,128], index: 2, kind: output, shape index: {}]  }
   0x1   :  { %v26_v1 = vld [vmem:[%s251_s1] sm:$0xff]  ;;  %v28_v2 = vld [vmem:[%s251_s1 + $0x10] sm:$0xff] }
   0x2   :  { %v14_v3 = vshrl.u32 %v13_v0, 7  ;;  %171 = vmatprep.mubr.msk.f32.mxu0 %vm30_vm0, %v26_v1  ;;  %174 = vmatprep.mubr.msk.f32.mxu1 %vm30_vm0, %v28_v2 }
   0x3   :  { %7 = vsyncpa [#allocation3], 0  ;;  %v152_v4 = vld [vmem:[%s250_s0] ss:$0 sm:$0xff]  ;;  %vm43_vm1 = vcmask 1043456   ;;  %v208_v6 = vmov 0.0  }
   0x4   :  { %v15_v5 = vadd.s32 8, %v14_v3  ;;  %vm20_vm3 = vcmp.eq.s32.totalorder %v14_v3, %v152_v4  ;;  %v27_v8 = vld [vmem:[%s251_s1 + $0x8] sm:$0xff]  ;;  %v29_v9 = vld [vmem:[%s251_s1 + $0x18] sm:$0xff]  ;;  %v209_v10 = vmov 1.0   ;;  %s210_s0 = smov [#allocation2]  }
   0x5   :  { %s141_s19 = sshll.u32 %s210_s0, 4  ;;  %s142_s19 = int_to_ptr.vmem [resolvable:$true] %s141_s19 }
   0x6   :  { %vm21_vm2 = vcmp.eq.s32.totalorder %v15_v5, %v152_v4  ;;  %s186_s1 = scalar_lea.vmem %s142_s19, 512  ;;  %p191_p1 = scmp.lt.s32.totalorder %s142_s19, %s142_s19 }
   0x7   :  { %v154_v7 = vsel %vm21_vm2, 1.0, %v208_v6  ;;  %p187_p0 = scmp.ne.s32.totalorder %s142_s19, %s186_s1  ;;  %p192_p2 = scmp.lt.s32.totalorder %s186_s1, %s186_s1 }
   0x8   :  { %167 = vmatprep.subr.msk.mxu0 %vm43_vm1, %v154_v7  ;;  %177 = vmatprep.subr.msk.mxu1 %vm43_vm1, %v154_v7 }
   0x9   :  { %168 = vmatpush3.msk.msra.mxu0 %vm43_vm1, %v154_v7  ;;  %179 = vmatpush3.msk.msra.mxu1 %vm43_vm1, %v154_v7  ;;  %p193_p3 = por %p192_p2, %p191_p1 }
   0xa   :  { %169 = vmatprep.subr.msk.mxu0 %vm20_vm3, %v209_v10  ;;  %178 = vmatprep.subr.msk.mxu1 %vm20_vm3, %v209_v10 }
   0xb   :  { %170 = vmatpush3.msk.msra.mxu0 %vm20_vm3, %v209_v10  ;;  %180 = vmatpush3.msk.msra.mxu1 %vm20_vm3, %v209_v10  ;;  %p194_p4 = pnand %p193_p3, %p187_p0 }
   0xc   :  { %172 = vmatmul.mubr.msk.f32.vlgmr.msra.gmra.mxu0 %vm30_vm0, %v27_v8  ;;  %175 = vmatmul.mubr.msk.f32.vlgmr.msra.gmra.mxu1 %vm30_vm0, %v29_v9 }
  0xcc   :  { %v173_v11 = vpop.f32.mrf.mxu0  ;;  %v176_v12 = vpop.f32.mrf.mxu1 }
  0xcd   :  { %133 = vst [vmem:[#allocation2 + $0x8] sm:$0xff] %v173_v11  ;;  %135 = vst [vmem:[#allocation2 + $0x18] sm:$0xff] %v176_v12 }
  0xce   :  { %v113_v13 = vpop.f32.mrf.mxu0  ;;  %v123_v14 = vpop.f32.mrf.mxu1 }
  0xcf   :  { %132 = vst [vmem:[#allocation2] sm:$0xff] %v113_v13  ;;  %134 = vst [vmem:[#allocation2 + $0x10] sm:$0xff] %v123_v14 }
  0xd0   :  { %197 = shalt.err (!%p194_p4)
}
  0xd1   :  { %s211_s20 = smov 128   ;;  %s212_s21 = smov 8  }
  0xd2   :  { %147 = dma.vmem_to_hbm [thread:$0]  %s142_s19, 512, %s252_s2, [#allocation3], %s211_s20, %s211_s20, %s212_s21  }
  0xd3   :  { %206 = dma.done.wait [#allocation3], 512  }
  0xd4   :  { %207 = vsyncadd [#allocation3], 4294966784 }
  0xd5   :  { %151 = vsyncpa [#allocation3], 1 }

</bundles_post_ra>
